<compile_context>
chip_gen: v5e
topology: v5e:2x2
jax: 0.10.0
libtpu: 0.0.40
codegen_flags: <defaults>
</compile_context>

<pallas_src>
import functools

import jax
import jax.numpy as jnp
from jax import lax
from jax.experimental import pallas as pl
from jax.experimental.pallas import tpu as pltpu


def _round_up(a: int, b: int) -> int:
    return ((a + b - 1) // b) * b


def _dense_dropout_kernel(seed_ref, x_ref, w_ref, b_ref, o_ref, *,
                          drop_p: float, deterministic: bool,
                          tile_rows: int, n_cols: int):
    # x_ref: (TMf, Kf)  w_ref: (Kf, Nf)  b_ref: (1, Nf)  o_ref: (TMf, Nf)
    y = jnp.dot(x_ref[...], w_ref[...], preferred_element_type=jnp.float32)
    y = y + b_ref[...].astype(jnp.float32)

    if (not deterministic) and drop_p > 0.0:
        # Fused inverted dropout via a counter-based hash keyed on the global
        # element index, so the mask does not depend on the tiling.  All ops are
        # plain 32-bit integer VPU ops (works on Mosaic and in interpret mode).
        row0 = pl.program_id(0) * tile_rows
        r = lax.broadcasted_iota(jnp.int32, y.shape, 0) + row0
        c = lax.broadcasted_iota(jnp.int32, y.shape, 1)
        h = (r * n_cols + c).astype(jnp.uint32)
        h = h + seed_ref[0].astype(jnp.uint32) * jnp.uint32(0x9E3779B9)
        h = (h ^ (h >> 16)) * jnp.uint32(0x21F0AAAD)
        h = (h ^ (h >> 15)) * jnp.uint32(0x735A2D97)
        h = h ^ (h >> 15)
        # Direct uint32 threshold compare: P(keep) = 1 - drop_p (no f32 temps).
        thr = jnp.uint32(min(0xFFFFFFFF, int(round(drop_p * 4294967296.0))))
        keep = h >= thr
        y = jnp.where(keep, y * jnp.float32(1.0 / (1.0 - drop_p)), jnp.float32(0.0))

    o_ref[...] = y.astype(o_ref.dtype)


def segformer_self_output(hidden_states, input_tensor, dense_weight, dense_bias, *,
                          drop_p: float = 0.0, deterministic: bool = True,
                          seed: int = 0, use_bf16: bool = False):
    """Pallas implementation of SegformerSelfOutput.forward.

    hidden_states: (B, S, hidden); dense_weight: (hidden, hidden) in PyTorch
    (out_features, in_features) layout; dense_bias: (hidden,).
    `input_tensor` is accepted for signature parity but unused (as in PyTorch).
    """
    del input_tensor  # SegformerSelfOutput.forward ignores it.

    B, S, N = hidden_states.shape
    M = B * S

    # Lane-density fold: pack G rows of width N into one lane-dense 128-wide row.
    G = (128 // N) if (0 < N <= 128 and 128 % N == 0) else 1
    Kf = Nf = G * N

    x2 = hidden_states.reshape(M, N)

    # Pad only to the fold / sublane alignment (8*G original rows).  Typical
    # shapes are already aligned -> zero-copy; ragged tile handling is done by
    # Pallas masking at the grid level, not by padding to a tile multiple.
    align = 8 * G
    M_pad = _round_up(M, align)
    padded = M_pad != M
    if padded:
        x2 = jnp.pad(x2, ((0, M_pad - M), (0, 0)))
    Mf = M_pad // G                        # folded rows, multiple of 8
    xf = x2.reshape(Mf, Kf)

    w_io = dense_weight.T                  # (in, out) = (N, N)
    if G > 1:
        wf = jnp.kron(jnp.eye(G, dtype=w_io.dtype), w_io)   # block-diag (Kf, Nf)
        bf = jnp.tile(dense_bias, (G,)).reshape(1, Nf)
    else:
        wf = w_io
        bf = dense_bias.reshape(1, Nf)

    out_dtype = hidden_states.dtype
    if use_bf16:
        # bf16 end-to-end (reads AND writes) on this bandwidth-bound op;
        # accumulation stays f32 on the MXU.
        xf = xf.astype(jnp.bfloat16)
        wf = wf.astype(jnp.bfloat16)
        out_dtype = jnp.bfloat16

    # Row tiling: ~1024 folded rows per tile for HBM-roofline efficiency, but
    # keep >= 2 grid steps when there is enough work (v7x dual-TC sharding).
    TM_TARGET = 1024
    if Mf <= 2 * TM_TARGET:
        ntiles = 2 if Mf >= 512 else 1
    else:
        ntiles = pl.cdiv(Mf, TM_TARGET)
    TMf = _round_up(pl.cdiv(Mf, ntiles), 8)
    grid = pl.cdiv(Mf, TMf)                # ragged last tile masked by Pallas

    seed_arr = jnp.array([seed], dtype=jnp.int32)
    in_bytes = jnp.dtype(xf.dtype).itemsize
    out_bytes = jnp.dtype(out_dtype).itemsize

    kernel = functools.partial(_dense_dropout_kernel,
                               drop_p=float(drop_p),
                               deterministic=bool(deterministic),
                               tile_rows=int(TMf), n_cols=int(Nf))

    out = pl.pallas_call(
        kernel,
        out_shape=jax.ShapeDtypeStruct((Mf, Nf), out_dtype),
        grid_spec=pltpu.PrefetchScalarGridSpec(
            num_scalar_prefetch=1,                          # dropout seed -> SMEM
            grid=(grid,),
            in_specs=[
                pl.BlockSpec((TMf, Kf), lambda i, seed_ref: (i, 0)),   # row tiles
                pl.BlockSpec((Kf, Nf), lambda i, seed_ref: (0, 0)),    # resident W
                pl.BlockSpec((1, Nf), lambda i, seed_ref: (0, 0)),     # resident bias
            ],
            out_specs=pl.BlockSpec((TMf, Nf), lambda i, seed_ref: (i, 0)),
        ),
        compiler_params=pltpu.CompilerParams(
            dimension_semantics=("parallel",),   # pipeline + v7x dual-TC sharding
        ),
        cost_estimate=pl.CostEstimate(
            flops=2 * Mf * Kf * Nf,
            transcendentals=0,
            bytes_accessed=Mf * Kf * in_bytes + Kf * Nf * in_bytes
                           + Nf * jnp.dtype(bf.dtype).itemsize
                           + Mf * Nf * out_bytes,
        ),
    )(seed_arr, xf, wf, bf)

    out = out.reshape(M_pad, N)
    if padded:
        out = out[:M]
    return out.reshape(B, S, N)


if __name__ == "__main__":
    # Small shapes consistent with the module: (batch=2, seq=8, hidden=32).
    B, S, hidden = 2, 8, 32
    drop_p = 0.1  # config.hidden_dropout_prob

    key = jax.random.PRNGKey(0)
    kx, kw, kb = jax.random.split(key, 3)
    x = jax.random.normal(kx, (B, S, hidden), dtype=jnp.float32)
    w = 0.1 * jax.random.normal(kw, (hidden, hidden), dtype=jnp.float32)  # (out, in)
    b = 0.1 * jax.random.normal(kb, (hidden,), dtype=jnp.float32)

    # Eval mode: dropout is identity -> must match the dense reference.
    out_eval = segformer_self_output(x, x, w, b, drop_p=drop_p, deterministic=True)
    out_eval = jax.block_until_ready(out_eval)
    ref = x @ w.T + b
    assert out_eval.shape == ref.shape == (B, S, hidden)
    assert float(jnp.max(jnp.abs(out_eval - ref))) < 1e-4

    # Training mode: fused in-kernel dropout.  Every element is either exactly 0
    # (dropped) or dense/(1-p) (kept), independent of the random mask drawn.
    out_train = segformer_self_output(x, x, w, b, drop_p=drop_p,
                                      deterministic=False, seed=123)
    out_train = jax.block_until_ready(out_train)
    scaled = ref / (1.0 - drop_p)
    ok = jnp.isclose(out_train, 0.0, atol=1e-6) | jnp.isclose(
        out_train, scaled, rtol=1e-4, atol=1e-4)
    assert bool(jnp.all(ok))

    print("KERNEL_OK")
</pallas_src>

<mosaic_0001>
module attributes {stable_mosaic.version = 11 : i64} {
  func.func @_dense_dropout_kernel(%arg0: i32, %arg1: memref<1xi32, #tpu.memory_space<smem>>, %arg2: memref<8x128xf32, #tpu.memory_space<vmem>>, %arg3: memref<128x128xf32, #tpu.memory_space<vmem>>, %arg4: memref<1x128xf32, #tpu.memory_space<vmem>>, %arg5: memref<8x128xf32, #tpu.memory_space<vmem>>) attributes {dimension_semantics = [#tpu.dimension_semantics<parallel>], iteration_bounds = array<i64: 1>, scalar_prefetch = 1 : i64, scratch_operands = 0 : i64, tpu.core_type = #tpu.core_type<tc>, window_params = [{transform_indices = @transform_0, window_bounds = array<i64: 8, 128>}, {pipeline_mode = #tpu.pipeline_mode<synchronous>, transform_indices = @transform_1, window_bounds = array<i64: 128, 128>}, {pipeline_mode = #tpu.pipeline_mode<synchronous>, transform_indices = @transform_2, window_bounds = array<i64: 1, 128>}, {transform_indices = @transform_3, window_bounds = array<i64: 8, 128>}]} {
    %c0 = arith.constant 0 : index
    %c0_0 = arith.constant 0 : index
    %0 = vector.load %arg2[%c0, %c0_0] : memref<8x128xf32, #tpu.memory_space<vmem>>, vector<8x128xf32>
    %c0_1 = arith.constant 0 : index
    %c0_2 = arith.constant 0 : index
    %1 = vector.load %arg3[%c0_1, %c0_2] : memref<128x128xf32, #tpu.memory_space<vmem>>, vector<128x128xf32>
    %cst = arith.constant dense<0.000000e+00> : vector<8x128xf32>
    %2 = tpu.matmul %0, %1, %cst {dimension_numbers = #tpu.dot_dimension_numbers<[1], [0], [0], [1], [0, 0, 1, 1], [], []>} : vector<8x128xf32>, vector<128x128xf32>, vector<8x128xf32> -> vector<8x128xf32>
    %c0_3 = arith.constant 0 : index
    %c0_4 = arith.constant 0 : index
    %3 = vector.load %arg4[%c0_3, %c0_4] : memref<1x128xf32, #tpu.memory_space<vmem>>, vector<1x128xf32>
    %4 = vector.broadcast %3 : vector<1x128xf32> to vector<8x128xf32>
    %5 = arith.addf %2, %4 : vector<8x128xf32>
    %c0_5 = arith.constant 0 : index
    %c0_6 = arith.constant 0 : index
    %6 = vector.load %arg5[%c0_5, %c0_6] : memref<8x128xf32, #tpu.memory_space<vmem>>, vector<8x128xf32>
    tpu.vector_store %arg5[%c0_5, %c0_6], %5 {strides = array<i32>} : memref<8x128xf32, #tpu.memory_space<vmem>>, vector<8x128xf32>,
    return
  }
  func.func @transform_0(%arg0: i32, %arg1: memref<1xi32, #tpu.memory_space<smem>>) -> (i32, i32) {
    %c0_i32 = arith.constant 0 : i32
    %c0_i32_0 = arith.constant 0 : i32
    return %arg0, %c0_i32 : i32, i32
  }
  func.func @transform_1(%arg0: i32, %arg1: memref<1xi32, #tpu.memory_space<smem>>) -> (i32, i32) {
    %c0_i32 = arith.constant 0 : i32
    %c0_i32_0 = arith.constant 0 : i32
    %c0_i32_1 = arith.constant 0 : i32
    return %c0_i32, %c0_i32_0 : i32, i32
  }
  func.func @transform_2(%arg0: i32, %arg1: memref<1xi32, #tpu.memory_space<smem>>) -> (i32, i32) {
    %c0_i32 = arith.constant 0 : i32
    %c0_i32_0 = arith.constant 0 : i32
    %c0_i32_1 = arith.constant 0 : i32
    return %c0_i32, %c0_i32_0 : i32, i32
  }
  func.func @transform_3(%arg0: i32, %arg1: memref<1xi32, #tpu.memory_space<smem>>) -> (i32, i32) {
    %c0_i32 = arith.constant 0 : i32
    %c0_i32_0 = arith.constant 0 : i32
    return %arg0, %c0_i32 : i32, i32
  }
}

</mosaic_0001>

<bundles_post_ra>
// kernel: tpu_custom_call.1
= control target key start
LH: loop header
LB: loop body
LE: loop exit
PB: predicated region body
PF: predicated region fallthrough
CT: control target
= control target key end

     0   :  { %10 = vsyncpa [#allocation5], 0  ;;  %s233_s0 = inlined_call_operand.<no memory space> [shape: s32[1], index: 0, kind: input, shape index: {}]   ;;  %s234_s1 = inlined_call_operand.hbm [shape: f32[8,128], index: 1, kind: input, shape index: {}]   ;;  %s235_s2 = inlined_call_operand.hbm [shape: f32[128,128], index: 2, kind: input, shape index: {}]   ;;  %s236_s3 = inlined_call_operand.vmem [shape: f32[1,128], index: 3, kind: input, shape index: {}]   ;;  %s237_s4 = inlined_call_operand.hbm [shape: f32[8,128], index: 4, kind: output, shape index: {}]  }
   0x1   :  { %11 = vsyncpa [#allocation8], 0 }
   0x2   :  { %12 = vsyncpa [#allocation6], 0  ;;  %s18_s17 = sshll.u32 %s234_s1, 4  ;;  %s191_s0 = smov [#allocation4]   ;;  %s19_s17 = int_to_ptr.hbm [resolvable:$true] %s18_s17 }
   0x3   :  { %s20_s18 = sshll.u32 %s191_s0, 4  ;;  %s28_s21 = sshll.u32 %s235_s2, 4  ;;  %s21_s18 = int_to_ptr.vmem [resolvable:$true] %s20_s18  ;;  %s29_s21 = int_to_ptr.hbm [resolvable:$true] %s28_s21 }
   0x4   :  { %23 = dma.hbm_to_vmem [thread:$0]  %s19_s17, 128, %s21_s18, [#allocation5]  }
   0x5   :  { %s192_s22 = smov [#allocation7]   ;;  %s193_s24 = smov 128  }
   0x6   :  { %s30_s23 = sshll.u32 %s192_s22, 4  ;;  %s194_s25 = smov 8   ;;  %s31_s23 = int_to_ptr.vmem [resolvable:$true] %s30_s23 }
   0x7   :  { %36 = dma.hbm_to_vmem [thread:$0]  %s29_s21, 2048, %s31_s23, [#allocation8], %s193_s24, %s193_s24, %s194_s25  }
   0x8   :  { %185 = dma.done.wait [#allocation5], 128  }
   0x9   :  { %186 = vsyncadd [#allocation5], 4294967168 }
   0xa   :  { %187 = dma.done.wait [#allocation8], 2048  }
   0xb   :  { %188 = vsyncadd [#allocation8], 4294965248  ;;  %v63_v0 = vld [vmem:[#allocation7 + $0x78] sm:$0xff]  ;;  %v62_v1 = vld [vmem:[#allocation7 + $0x70] sm:$0xff]  ;;  %s195_s26 = smov [#allocation9]   ;;  %s96_s30 = sshll.u32 %s237_s4, 4  ;;  %s97_s30 = int_to_ptr.hbm [resolvable:$true] %s96_s30 }
   0xc   :  { %68 = vmatpush.msra.mxu0 %v63_v0  ;;  %v61_v2 = vld [vmem:[#allocation7 + $0x68] sm:$0xff]  ;;  %v60_v3 = vld [vmem:[#allocation7 + $0x60] sm:$0xff]  ;;  %v59_v4 = vld [vmem:[#allocation7 + $0x58] sm:$0xff]  ;;  %s94_s27 = sshll.u32 %s195_s26, 4  ;;  %s95_s27 = int_to_ptr.vmem [resolvable:$true] %s94_s27 }
   0xd   :  { %v58_v5 = vld [vmem:[#allocation7 + $0x50] sm:$0xff]  ;;  %v57_v6 = vld [vmem:[#allocation7 + $0x48] sm:$0xff]  ;;  %v56_v7 = vld [vmem:[#allocation7 + $0x40] sm:$0xff] }
   0xe   :  { %69 = vmatpush.msra.mxu0 %v62_v1  ;;  %v55_v8 = vld [vmem:[#allocation7 + $0x38] sm:$0xff]  ;;  %v54_v9 = vld [vmem:[#allocation7 + $0x30] sm:$0xff]  ;;  %v53_v10 = vld [vmem:[#allocation7 + $0x28] sm:$0xff] }
   0xf   :  { %v52_v11 = vld [vmem:[#allocation7 + $0x20] sm:$0xff]  ;;  %v51_v12 = vld [vmem:[#allocation7 + $0x18] sm:$0xff]  ;;  %v50_v13 = vld [vmem:[#allocation7 + $0x10] sm:$0xff] }
  0x10   :  { %70 = vmatpush.msra.mxu0 %v61_v2  ;;  %v49_v14 = vld [vmem:[#allocation7 + $0x8] sm:$0xff]  ;;  %v48_v15 = vld [vmem:[#allocation7] sm:$0xff]  ;;  %v47_v16 = vld [vmem:[#allocation4] sm:$0xff] }
  0x11   :  { %v112_v17 = vld [vmem:[%s236_s3] ss:$0 sm:$0xff] }
  0x12   :  { %71 = vmatpush.msra.mxu0 %v60_v3 }
  0x14   :  { %72 = vmatpush.msra.mxu0 %v59_v4 }
  0x16   :  { %73 = vmatpush.msra.mxu0 %v58_v5 }
  0x18   :  { %74 = vmatpush.msra.mxu0 %v57_v6 }
  0x1a   :  { %75 = vmatpush.msra.mxu0 %v56_v7 }
  0x1c   :  { %76 = vmatpush.msra.mxu0 %v55_v8 }
  0x1e   :  { %77 = vmatpush.msra.mxu0 %v54_v9 }
  0x20   :  { %78 = vmatpush.msra.mxu0 %v53_v10 }
  0x22   :  { %79 = vmatpush.msra.mxu0 %v52_v11 }
  0x24   :  { %80 = vmatpush.msra.mxu0 %v51_v12 }
  0x26   :  { %81 = vmatpush.msra.mxu0 %v50_v13 }
  0x28   :  { %82 = vmatpush.msra.mxu0 %v49_v14 }
  0x2a   :  { %83 = vmatpush.msra.mxu0 %v48_v15 }
  0x2b   :  { %84 = vmatmul.f32.vlgmr.msra.gmra.mxu0 %v47_v16 }
  0xa8   :  { %v85_v18 = vpop.f32.mrf.mxu0 }
  0xa9   :  { %v86_v19 = vadd.f32 %v112_v17, %v85_v18 }
  0xab   :  { %88 = vst [vmem:[#allocation9] sm:$0xff] %v86_v19 }
  0xac   :  { %99 = dma.vmem_to_hbm [thread:$0]  %s95_s27, 128, %s97_s30, [#allocation6]  }
  0xad   :  { %189 = dma.done.wait [#allocation6], 128  }
  0xae   :  { %190 = vsyncadd [#allocation6], 4294967168 }
  0xaf   :  { %104 = vsyncpa [#allocation5], 1 }
  0xb0   :  { %105 = vsyncpa [#allocation8], 1 }
  0xb1   :  { %106 = vsyncpa [#allocation6], 1 }

</bundles_post_ra>
